<compile_context>
chip_gen: v6e
topology: v6e:2x2x1
jax: 0.10.0
libtpu: 0.0.40
codegen_flags: <defaults>
</compile_context>

<pallas_src>
import functools

import jax
import jax.numpy as jnp
from jax.experimental import pallas as pl
from jax.experimental.pallas import tpu as pltpu

_LANES = 128
_CHUNK_ROWS = 256  # rows per in-kernel compute chunk (128 KiB per operand in f32)


def _round_up(x, m):
    return (x + m - 1) // m * m


def _kl_div_kernel(inp_ref, tgt_ref, out_ref, *, tm, chunk, valid_rows, bps,
                   mask_from_block):
    c = pl.program_id(0)          # parallel split (2 TensorCores on v7x)
    i = pl.program_id(1)          # sequential blocks within the split
    blk = c * bps + i             # logical (UNclamped) block index

    # Zero this split's resident (1, 8, 128) partial-sum block on its first step.
    @pl.when(i == 0)
    def _():
        out_ref[...] = jnp.zeros_like(out_ref)

    nchunks = tm // chunk

    def chunk_sum(r0, masked):
        # Load one (chunk, 128) slab straight from the pipelined VMEM block;
        # keeps live temporaries at chunk size regardless of tm.
        t = tgt_ref[pl.ds(r0, chunk), :].astype(jnp.float32)
        x = inp_ref[pl.ds(r0, chunk), :].astype(jnp.float32)
        valid = t > 0
        if masked:
            # Global row index; rows past the array end (partial last block or
            # phantom duplicated block) contribute exactly 0.
            row_ids = blk * tm + r0 + jax.lax.broadcasted_iota(
                jnp.int32, (chunk, _LANES), 0)
            valid = valid & (row_ids < valid_rows)
        # Matches torch: target * (log(target) - log(input)); masked lanes -> 0.
        pw = jnp.where(valid, t * (jnp.log(t) - jnp.log(x)), 0.0)
        # Fold chunk rows down to one (8, 128) vreg with VPU adds.
        return pw.reshape(chunk // 8, 8, _LANES).sum(axis=0)

    def accumulate(masked):
        if nchunks == 1:
            partial = chunk_sum(0, masked)
        else:
            partial = jax.lax.fori_loop(
                0, nchunks,
                lambda j, acc: acc + chunk_sum(
                    pl.multiple_of(j * chunk, chunk), masked),
                jnp.zeros((8, _LANES), jnp.float32))
        out_ref[...] += partial[None, :, :]

    if mask_from_block is None:
        accumulate(False)                      # no block ever needs the row mask
    elif mask_from_block <= 0:
        accumulate(True)                       # every block needs the row mask
    else:
        @pl.when(blk < mask_from_block)
        def _():
            accumulate(False)

        @pl.when(blk >= mask_from_block)
        def _():
            accumulate(True)


def kl_div_loss(inp, tgt, *, tile_rows=4096):
    """Equivalent of KLDivLoss().forward(inp, tgt) (reduction='mean')."""
    assert inp.shape == tgt.shape
    numel = inp.size
    flat_i = inp.reshape(-1)
    flat_t = tgt.reshape(-1)

    rows = numel // _LANES
    n_aligned = rows * _LANES

    total = jnp.float32(0.0)

    if rows > 0:
        if n_aligned == numel:
            # Common lane-aligned case: pure bitcast reshape, no extra HBM copy.
            inp2d = flat_i.reshape(rows, _LANES)
            tgt2d = flat_t.reshape(rows, _LANES)
        else:
            # Rare ragged case: the kernel streams only the 128-aligned prefix
            # (tail handled in JAX below).  No full-array concatenate/pad copy.
            inp2d = flat_i[:n_aligned].reshape(rows, _LANES)
            tgt2d = flat_t[:n_aligned].reshape(rows, _LANES)

        # Tile selection: big blocks (default 4096 rows x 128 lanes = 2 MiB per
        # input per step, 8 MiB double-buffered) for HBM-roofline streaming.
        # tm is a multiple of the in-kernel chunk and of 16 (bf16-safe tiling).
        rows16 = _round_up(rows, 16)
        if rows16 <= _CHUNK_ROWS:
            tm = rows16
            chunk = tm
        else:
            chunk = _CHUNK_ROWS
            tm = min(_round_up(tile_rows, chunk), _round_up(rows16, chunk))

        n_blocks = pl.cdiv(rows, tm)
        # Always split the block range 2 ways when possible so v7x's two
        # TensorCores each stream ~half the rows (harmless on v5e/v6e).
        n_split = 2 if n_blocks >= 2 else 1
        bps = pl.cdiv(n_blocks, n_split)

        # Which logical blocks need the in-kernel row mask?
        if rows % tm != 0:
            mask_from_block = n_blocks - 1      # partial last block (+ phantom)
        elif n_split * bps > n_blocks:
            mask_from_block = n_blocks          # only the phantom duplicate
        else:
            mask_from_block = None              # every block is full

        kernel = functools.partial(
            _kl_div_kernel, tm=tm, chunk=chunk, valid_rows=rows, bps=bps,
            mask_from_block=mask_from_block)

        def in_index_map(c, i):
            # Clamp so the phantom block (odd n_blocks with the 2-way split)
            # re-reads the last real block; the row mask zeroes its sum.
            return (jnp.minimum(c * bps + i, n_blocks - 1), 0)

        partials = pl.pallas_call(
            kernel,
            out_shape=jax.ShapeDtypeStruct((n_split, 8, _LANES), jnp.float32),
            grid_spec=pltpu.PrefetchScalarGridSpec(
                num_scalar_prefetch=0,
                grid=(n_split, bps),
                in_specs=[
                    pl.BlockSpec((tm, _LANES), in_index_map),
                    pl.BlockSpec((tm, _LANES), in_index_map),
                ],
                out_specs=pl.BlockSpec((1, 8, _LANES), lambda c, i: (c, 0, 0)),
            ),
            compiler_params=pltpu.CompilerParams(
                dimension_semantics=("parallel", "arbitrary"),
            ),
        )(inp2d, tgt2d)

        total = total + jnp.sum(partials, dtype=jnp.float32)

    if n_aligned < numel:
        # <128-element ragged tail: negligible work, do it in plain JAX.
        tt = flat_t[n_aligned:].astype(jnp.float32)
        ti = flat_i[n_aligned:].astype(jnp.float32)
        total = total + jnp.sum(
            jnp.where(tt > 0, tt * (jnp.log(tt) - jnp.log(ti)), 0.0))

    # 'mean' reduction: divide by the ORIGINAL element count.
    return (total / jnp.float32(numel)).astype(jnp.float32)


if __name__ == "__main__":
    key = jax.random.PRNGKey(0)
    k1, k2 = jax.random.split(key)

    B, C, H, W = 2, 4, 16, 16  # NCHW, as a torch conv-style input would be

    # Valid probability distributions over the channel axis (typical KLDivLoss
    # usage: input probs whose log is taken, target probs).
    logits_in = jax.random.normal(k1, (B, C, H, W), dtype=jnp.float32)
    logits_tg = jax.random.normal(k2, (B, C, H, W), dtype=jnp.float32)
    inp = jax.nn.softmax(logits_in, axis=1)
    tgt = jax.nn.softmax(logits_tg, axis=1)

    loss = jax.jit(kl_div_loss)(inp, tgt)
    jax.block_until_ready(loss)

    # Pure-JAX reference (same math as torch.nn.functional.kl_div, 'mean').
    ref = jnp.mean(
        jnp.where(tgt > 0, tgt * (jnp.log(tgt) - jnp.log(inp)), 0.0)
    )
    assert jnp.allclose(loss, ref, rtol=1e-5, atol=1e-6), (loss, ref)

    print("KERNEL_OK")
</pallas_src>

<mosaic_0001>
module attributes {stable_mosaic.version = 11 : i64} {
  func.func @_kl_div_kernel(%arg0: i32, %arg1: i32, %arg2: memref<16x128xf32, #tpu.memory_space<vmem>>, %arg3: memref<16x128xf32, #tpu.memory_space<vmem>>, %arg4: memref<1x8x128xf32, #tpu.memory_space<vmem>>) attributes {dimension_semantics = [#tpu.dimension_semantics<parallel>, #tpu.dimension_semantics<arbitrary>], iteration_bounds = array<i64: 1, 1>, scalar_prefetch = 0 : i64, scratch_operands = 0 : i64, tpu.core_type = #tpu.core_type<tc>, window_params = [{transform_indices = @transform_0, window_bounds = array<i64: 16, 128>}, {transform_indices = @transform_1, window_bounds = array<i64: 16, 128>}, {transform_indices = @transform_2, window_bounds = array<i64: 1, 8, 128>}]} {
    %c0_i32 = arith.constant 0 : i32
    %0 = arith.cmpi eq, %arg1, %c0_i32 : i32
    %1 = arith.extui %0 : i1 to i32
    %c0_i32_0 = arith.constant 0 : i32
    %2 = arith.cmpi ne, %1, %c0_i32_0 : i32
    scf.if %2 {
      %cst_12 = arith.constant 0.000000e+00 : f32
      %19 = vector.broadcast %cst_12 : f32 to vector<1x8x128xf32>
      %c0_13 = arith.constant 0 : index
      %c0_14 = arith.constant 0 : index
      %c0_15 = arith.constant 0 : index
      %20 = vector.load %arg4[%c0_13, %c0_14, %c0_15] : memref<1x8x128xf32, #tpu.memory_space<vmem>>, vector<1x8x128xf32>
      tpu.vector_store %arg4[%c0_13, %c0_14, %c0_15], %19 {strides = array<i32>} : memref<1x8x128xf32, #tpu.memory_space<vmem>>, vector<1x8x128xf32>,
    } else {
    }
    %c0 = arith.constant 0 : index
    %c0_1 = arith.constant 0 : index
    %3 = vector.load %arg3[%c0, %c0_1] : memref<16x128xf32, #tpu.memory_space<vmem>>, vector<16x128xf32>
    %c0_2 = arith.constant 0 : index
    %c0_3 = arith.constant 0 : index
    %4 = vector.load %arg2[%c0_2, %c0_3] : memref<16x128xf32, #tpu.memory_space<vmem>>, vector<16x128xf32>
    %cst = arith.constant 0.000000e+00 : f32
    %5 = vector.broadcast %cst : f32 to vector<16x128xf32>
    %6 = arith.cmpf ogt, %3, %5 : vector<16x128xf32>
    %7 = math.log %3 : vector<16x128xf32>
    %8 = math.log %4 : vector<16x128xf32>
    %9 = arith.subf %7, %8 : vector<16x128xf32>
    %10 = arith.mulf %3, %9 : vector<16x128xf32>
    %cst_4 = arith.constant 0.000000e+00 : f32
    %11 = vector.broadcast %cst_4 : f32 to vector<16x128xf32>
    %12 = arith.select %6, %10, %11 : vector<16x128xi1>, vector<16x128xf32>
    %13 = vector.shape_cast %12 : vector<16x128xf32> to vector<2x8x128xf32>
    %cst_5 = arith.constant dense<0.000000e+00> : vector<8x128xf32>
    %14 = vector.multi_reduction <add>, %13, %cst_5 [0] : vector<2x8x128xf32> to vector<8x128xf32>
    %c0_6 = arith.constant 0 : index
    %c0_7 = arith.constant 0 : index
    %c0_8 = arith.constant 0 : index
    %15 = vector.load %arg4[%c0_6, %c0_7, %c0_8] : memref<1x8x128xf32, #tpu.memory_space<vmem>>, vector<1x8x128xf32>
    %16 = vector.shape_cast %14 : vector<8x128xf32> to vector<1x8x128xf32>
    %17 = arith.addf %15, %16 : vector<1x8x128xf32>
    %c0_9 = arith.constant 0 : index
    %c0_10 = arith.constant 0 : index
    %c0_11 = arith.constant 0 : index
    %18 = vector.load %arg4[%c0_9, %c0_10, %c0_11] : memref<1x8x128xf32, #tpu.memory_space<vmem>>, vector<1x8x128xf32>
    tpu.vector_store %arg4[%c0_9, %c0_10, %c0_11], %17 {strides = array<i32>} : memref<1x8x128xf32, #tpu.memory_space<vmem>>, vector<1x8x128xf32>,
    return
  }
  func.func @transform_0(%arg0: i32, %arg1: i32) -> (i32, i32) {
    %c1_i32 = arith.constant 1 : i32
    %0 = arith.muli %arg0, %c1_i32 : i32
    %1 = arith.addi %0, %arg1 : i32
    %c0_i32 = arith.constant 0 : i32
    %2 = arith.minsi %1, %c0_i32 : i32
    %c0_i32_0 = arith.constant 0 : i32
    %c0_i32_1 = arith.constant 0 : i32
    return %2, %c0_i32_0 : i32, i32
  }
  func.func @transform_1(%arg0: i32, %arg1: i32) -> (i32, i32) {
    %c1_i32 = arith.constant 1 : i32
    %0 = arith.muli %arg0, %c1_i32 : i32
    %1 = arith.addi %0, %arg1 : i32
    %c0_i32 = arith.constant 0 : i32
    %2 = arith.minsi %1, %c0_i32 : i32
    %c0_i32_0 = arith.constant 0 : i32
    %c0_i32_1 = arith.constant 0 : i32
    return %2, %c0_i32_0 : i32, i32
  }
  func.func @transform_2(%arg0: i32, %arg1: i32) -> (i32, i32, i32) {
    %c0_i32 = arith.constant 0 : i32
    %c0_i32_0 = arith.constant 0 : i32
    %c0_i32_1 = arith.constant 0 : i32
    return %arg0, %c0_i32, %c0_i32_0 : i32, i32, i32
  }
}

</mosaic_0001>

<bundles_post_ra>
// kernel: kl_div_loss.1
= control target key start
LH: loop header
LB: loop body
LE: loop exit
PB: predicated region body
PF: predicated region fallthrough
CT: control target
= control target key end

     0   :  { %s159_s0 = inlined_call_operand.vmem [shape: f32[16,128], index: 0, kind: input, shape index: {}]   ;;  %s160_s1 = inlined_call_operand.vmem [shape: f32[16,128], index: 1, kind: input, shape index: {}]   ;;  %s161_s2 = inlined_call_operand.vmem [shape: f32[1,8,128], index: 2, kind: output, shape index: {}]  }
   0x1   :  { %v80_v0 = vld [vmem:[%s160_s1] sm:$0xff]  ;;  %v81_v1 = vld [vmem:[%s160_s1 + $0x8] sm:$0xff] }
   0x2   :  { %v82_v2 = vld [vmem:[%s159_s0] sm:$0xff]  ;;  %v83_v3 = vld [vmem:[%s159_s0 + $0x8] sm:$0xff]  ;;  %121 = vlog2.f32 %v80_v0  ;;  %vm84_vm0 = vcmp.gt.f32.partialorder %v80_v0, 0.0  ;;  %vm85_vm1 = vcmp.gt.f32.partialorder %v81_v1, 0.0 }
   0x3   :  { %123 = vlog2.f32 %v81_v1 }
   0x4   :  { %125 = vlog2.f32 %v82_v2 }
   0x5   :  { %127 = vlog2.f32 %v83_v3 }
   0xf   :  { %v122_v4 = vpop.eup %121 }
  0x10   :  { %v124_v5 = vpop.eup %123  ;;  %v87_v6 = vmul.f32 0.6931472, %v122_v4 }
  0x11   :  { %v126_v7 = vpop.eup %125  ;;  %v89_v8 = vmul.f32 0.6931472, %v124_v5 }
  0x12   :  { %v128_v9 = vpop.eup %127  ;;  %v91_v10 = vmul.f32 0.6931472, %v126_v7 }
  0x13   :  { %v93_v11 = vmul.f32 0.6931472, %v128_v9 }
  0x14   :  { %v94_v12 = vsub.f32 %v87_v6, %v91_v10 }
  0x15   :  { %v95_v13 = vsub.f32 %v89_v8, %v93_v11 }
  0x16   :  { %v96_v14 = vmul.f32 %v94_v12, %v80_v0 }
  0x17   :  { %v97_v15 = vmul.f32 %v95_v13, %v81_v1 }
  0x18   :  { %v98_v16 = vsel %vm84_vm0, %v96_v14, 0.0 }
  0x19   :  { %v99_v17 = vsel %vm85_vm1, %v97_v15, 0.0 }
  0x1a   :  { %v100_v18 = vadd.f32 %v99_v17, %v98_v16 }
  0x1c   :  { %103 = vst [vmem:[%s161_s2] sm:$0xff] %v100_v18 }

</bundles_post_ra>
